<compile_context>
chip_gen: v6e
topology: v6e:2x2x1
jax: 0.10.0
libtpu: 0.0.40
codegen_flags: <defaults>
</compile_context>

<pallas_src>
import jax
import jax.numpy as jnp
from jax.experimental import pallas as pl
from jax.experimental.pallas import tpu as pltpu


_LANE = 128
_TARGET_STEP_BYTES = 4 << 20   # in+out HBM payload per grid step (~4 MiB)
_MIN_STEP_BYTES = 256 << 10    # never shrink a step below this when adding grid points


def _pick_tiling(N, C, Cout, HW, itemsize, max_nb):
    """Choose (Nb, tile_hw) so each grid step moves ~_TARGET_STEP_BYTES of in+out."""
    per_lane = (C + Cout) * itemsize          # in+out bytes per lane per sample

    # Lane-axis (H*W) tile: a 128-multiple (Pallas masks the ragged final block,
    # so HW need not divide evenly); full extent when HW <= 128.
    if HW <= _LANE:
        tile_hw = HW
    else:
        cap = max(_LANE, _TARGET_STEP_BYTES // per_lane)
        cap -= cap % _LANE
        hw_floor = HW - (HW % _LANE) if HW % _LANE else HW
        tile_hw = min(cap, hw_floor)

    # Batch packing: if one sample's HW tile is still small, block several batch
    # elements per grid step so bytes/step stay at MiB scale.
    sample_bytes = per_lane * tile_hw
    nb = max(1, min(N, max_nb, _TARGET_STEP_BYTES // max(sample_bytes, 1)))

    # Keep a handful of grid steps alive (DMA/compute overlap + balanced work for
    # v7x's two TensorCores) as long as each step still moves useful data.
    def n_steps(nb_, t_):
        return (-(-N // nb_)) * (-(-HW // t_))

    while n_steps(nb, tile_hw) < 4 and nb > 1:
        new_nb = (nb + 1) // 2
        if new_nb * sample_bytes < _MIN_STEP_BYTES:
            break
        nb = new_nb
    while n_steps(nb, tile_hw) < 4 and tile_hw > _LANE:
        half = tile_hw // 2
        new_t = max(_LANE, half - (half % _LANE))
        if new_t == tile_hw or nb * per_lane * new_t < _MIN_STEP_BYTES:
            break
        tile_hw = new_t

    return nb, tile_hw


def _make_mxu_kernel(nb):
    """C, Cout >= 16: per-sample [Cout,C] @ [C,T] on the MXU, f32 accumulation."""
    def kernel(x_ref, w_ref, b_ref, o_ref):
        # x_ref: [Nb, C, T] VMEM; w_ref: [Cout, C] (resident); b_ref: [Cout, 1] f32
        w = w_ref[...]
        b = b_ref[...]
        for i in range(nb):                      # static unroll; nb <= 8 for MXU path
            y = jnp.dot(w, x_ref[i], preferred_element_type=jnp.float32)  # [Cout, T]
            o_ref[i] = (y + b).astype(o_ref.dtype)
    return kernel


def _make_vpu_kernel(C):
    """Tiny contraction (C, Cout < 16): unrolled VPU FMAs, f32 accumulation,
    everything lane-dense; batch dim handled by broadcasting (no unroll over Nb)."""
    def kernel(x_ref, w_ref, b_ref, o_ref):
        # x_ref: [Nb, C, T]; w_ref: [Cout, C] f32; b_ref: [Cout, 1] f32
        x = x_ref[...].astype(jnp.float32)       # no-op for f32 I/O
        w = w_ref[...]                            # already f32 (accumulation dtype)
        y = x[:, 0:1, :] * w[:, 0:1]              # [Nb, Cout, T] outer-product term
        for c in range(1, C):                     # static unroll, C is tiny
            y = y + x[:, c:c + 1, :] * w[:, c:c + 1]
        o_ref[...] = (y + b_ref[...]).astype(o_ref.dtype)
    return kernel


def stochastic_depth_forward(x_nchw, weight, bias, *, p: float, training: bool = False):
    """StochasticDepth(Conv2d(C, Cout, 1)) forward with drop prob `p`.

    x_nchw: [N, C, H, W]
    weight: [C_in, C_out]  (1x1 conv weight reshaped)
    bias:   [C_out]
    """
    if training:
        # torch: `if self.training and self._sampler.uniform_():` -> uniform in
        # [0,1) is truthy with probability 1, so inputs are returned unchanged.
        return x_nchw

    N, C, H, W = x_nchw.shape
    Cout = weight.shape[1]
    HW = H * W
    itemsize = jnp.dtype(x_nchw.dtype).itemsize

    # Free (contiguous) reshape, no transpose: channels on sublanes, H*W on lanes.
    x3 = x_nchw.reshape(N, C, HW)

    use_mxu = (C >= 16 and Cout >= 16)
    # MXU path unrolls over Nb -> keep it modest; VPU path broadcasts over Nb.
    nb, tile_hw = _pick_tiling(N, C, Cout, HW, itemsize, max_nb=8 if use_mxu else 256)
    grid = (pl.cdiv(N, nb), pl.cdiv(HW, tile_hw))

    # Fold p into the (tiny) weight/bias so the kernel does no extra VPU scale.
    # Dtypes are intentional: MXU path keeps w in the I/O dtype (native MXU operand,
    # f32 accumulation via preferred_element_type); VPU path keeps w in f32 so both
    # paths accumulate in f32. Bias is always f32 (added post-accumulation).
    w_dtype = x_nchw.dtype if use_mxu else jnp.float32
    w_scaled = (p * weight).T.astype(w_dtype)                  # [Cout, C]
    b_scaled = (p * bias).reshape(Cout, 1).astype(jnp.float32)  # [Cout, 1]

    kernel = _make_mxu_kernel(nb) if use_mxu else _make_vpu_kernel(C)

    # VMEM budget: double-buffered in+out blocks plus in-kernel f32 temporaries,
    # with headroom; >= v5e's 16 MiB scoped default, <= v7x's 64 MiB physical.
    step_bytes = nb * (C + Cout) * tile_hw * itemsize
    vmem_limit = int(min(56 << 20, max(32 << 20, 4 * step_bytes + (4 << 20))))

    cost = pl.CostEstimate(
        flops=int(2 * N * Cout * C * HW),
        transcendentals=0,
        bytes_accessed=int(itemsize * (N * C * HW + N * Cout * HW) + 4 * Cout * (C + 1)),
    )

    out3 = pl.pallas_call(
        kernel,
        out_shape=jax.ShapeDtypeStruct((N, Cout, HW), x_nchw.dtype),
        grid_spec=pltpu.PrefetchScalarGridSpec(
            num_scalar_prefetch=0,
            grid=grid,
            in_specs=[
                # x[n-block, :, t-block] -> kernel sees [Nb, C, tile_hw]
                pl.BlockSpec((nb, C, tile_hw), lambda n, t: (n, 0, t)),
                # weight / bias: whole (tiny) arrays, constant block index -> resident
                pl.BlockSpec((Cout, C), lambda n, t: (0, 0)),
                pl.BlockSpec((Cout, 1), lambda n, t: (0, 0)),
            ],
            out_specs=pl.BlockSpec((nb, Cout, tile_hw), lambda n, t: (n, 0, t)),
        ),
        compiler_params=pltpu.CompilerParams(
            # Both axes independent -> shardable across v7x's 2 TensorCores
            # (no-op on v5e/v6e's single TC).
            dimension_semantics=("parallel", "parallel"),
            vmem_limit_bytes=vmem_limit,
        ),
        cost_estimate=cost,
    )(x3, w_scaled, b_scaled)

    return out3.reshape(N, Cout, H, W)


def reference_forward(x_nchw, weight, bias, *, p: float):
    """Pure-JAX reference for the eval path: p * conv1x1(x), NCHW in / NCHW out."""
    y = jnp.einsum("nchw,co->nohw", x_nchw, weight) + bias[None, :, None, None]
    return p * y


if __name__ == "__main__":
    key = jax.random.PRNGKey(0)
    p = 0.5

    # ---- Case 1: tiny channel count (module as instantiated) -> VPU path,
    #              small HW -> batch-packed grid step.
    k_x, k_w, k_b = jax.random.split(key, 3)
    N, C, H, W = 2, 4, 16, 16
    x = jax.random.normal(k_x, (N, C, H, W), dtype=jnp.float32)
    bound = 1.0 / (C ** 0.5)
    w = jax.random.uniform(k_w, (C, C), minval=-bound, maxval=bound, dtype=jnp.float32)
    b = jax.random.uniform(k_b, (C,), minval=-bound, maxval=bound, dtype=jnp.float32)

    out = jax.block_until_ready(stochastic_depth_forward(x, w, b, p=p, training=False))
    ref = reference_forward(x, w, b, p=p)
    assert out.shape == (N, C, H, W)
    assert jnp.allclose(out, ref, atol=1e-5, rtol=1e-5), "mismatch vs reference (small C)"

    # Training path: module skipped (sampler.uniform_() truthy w.p. 1) -> identity.
    out_train = jax.block_until_ready(
        stochastic_depth_forward(x, w, b, p=p, training=True))
    assert jnp.array_equal(out_train, x)

    # ---- Case 2: larger channel count -> MXU dot path.
    key2 = jax.random.PRNGKey(1)
    k_x2, k_w2, k_b2 = jax.random.split(key2, 3)
    C2 = 32
    x2 = jax.random.normal(k_x2, (N, C2, H, W), dtype=jnp.float32)
    bound2 = 1.0 / (C2 ** 0.5)
    w2 = jax.random.uniform(k_w2, (C2, C2), minval=-bound2, maxval=bound2, dtype=jnp.float32)
    b2 = jax.random.uniform(k_b2, (C2,), minval=-bound2, maxval=bound2, dtype=jnp.float32)

    out2 = jax.block_until_ready(stochastic_depth_forward(x2, w2, b2, p=p, training=False))
    ref2 = reference_forward(x2, w2, b2, p=p)
    assert jnp.allclose(out2, ref2, atol=1e-4, rtol=1e-5), "mismatch vs reference (MXU path)"

    # ---- Case 3: non-128-multiple spatial size (H*W = 400) + batch packing
    #              -> exercises the ragged-edge masked block and cdiv grid.
    key3 = jax.random.PRNGKey(2)
    k_x3, k_w3, k_b3 = jax.random.split(key3, 3)
    N3, C3, H3, W3 = 3, 4, 20, 20
    x3_in = jax.random.normal(k_x3, (N3, C3, H3, W3), dtype=jnp.float32)
    bound3 = 1.0 / (C3 ** 0.5)
    w3 = jax.random.uniform(k_w3, (C3, C3), minval=-bound3, maxval=bound3, dtype=jnp.float32)
    b3 = jax.random.uniform(k_b3, (C3,), minval=-bound3, maxval=bound3, dtype=jnp.float32)

    out3 = jax.block_until_ready(stochastic_depth_forward(x3_in, w3, b3, p=p, training=False))
    ref3 = reference_forward(x3_in, w3, b3, p=p)
    assert jnp.allclose(out3, ref3, atol=1e-5, rtol=1e-5), "mismatch vs reference (ragged HW)"

    print("KERNEL_OK")
</pallas_src>

<mosaic_0001>
module attributes {stable_mosaic.version = 11 : i64} {
  func.func @kernel(%arg0: i32, %arg1: i32, %arg2: memref<2x4x256xf32, #tpu.memory_space<vmem>>, %arg3: memref<4x4xf32, #tpu.memory_space<vmem>>, %arg4: memref<4x1xf32, #tpu.memory_space<vmem>>, %arg5: memref<2x4x256xf32, #tpu.memory_space<vmem>>) attributes {dimension_semantics = [#tpu.dimension_semantics<parallel>, #tpu.dimension_semantics<parallel>], iteration_bounds = array<i64: 1, 1>, scalar_prefetch = 0 : i64, scratch_operands = 0 : i64, tpu.core_type = #tpu.core_type<tc>, window_params = [{transform_indices = @transform_0, window_bounds = array<i64: 2, 4, 256>}, {pipeline_mode = #tpu.pipeline_mode<synchronous>, transform_indices = @transform_1, window_bounds = array<i64: 4, 4>}, {pipeline_mode = #tpu.pipeline_mode<synchronous>, transform_indices = @transform_2, window_bounds = array<i64: 4, 1>}, {transform_indices = @transform_3, window_bounds = array<i64: 2, 4, 256>}]} {
    %c0 = arith.constant 0 : index
    %c0_0 = arith.constant 0 : index
    %c0_1 = arith.constant 0 : index
    %0 = vector.load %arg2[%c0, %c0_0, %c0_1] : memref<2x4x256xf32, #tpu.memory_space<vmem>>, vector<2x4x256xf32>
    %c0_2 = arith.constant 0 : index
    %c0_3 = arith.constant 0 : index
    %1 = vector.load %arg3[%c0_2, %c0_3] : memref<4x4xf32, #tpu.memory_space<vmem>>, vector<4x4xf32>
    %2 = vector.extract_strided_slice %0 {offsets = [0, 0, 0], sizes = [2, 1, 256], strides = [1, 1, 1]} : vector<2x4x256xf32> to vector<2x1x256xf32>
    %3 = vector.extract_strided_slice %1 {offsets = [0, 0], sizes = [4, 1], strides = [1, 1]} : vector<4x4xf32> to vector<4x1xf32>
    %4 = vector.shape_cast %3 : vector<4x1xf32> to vector<1x4x1xf32>
    %5 = vector.broadcast %2 : vector<2x1x256xf32> to vector<2x4x256xf32>
    %6 = vector.broadcast %4 : vector<1x4x1xf32> to vector<2x4x256xf32>
    %7 = arith.mulf %5, %6 : vector<2x4x256xf32>
    %8 = vector.extract_strided_slice %0 {offsets = [0, 1, 0], sizes = [2, 1, 256], strides = [1, 1, 1]} : vector<2x4x256xf32> to vector<2x1x256xf32>
    %9 = vector.extract_strided_slice %1 {offsets = [0, 1], sizes = [4, 1], strides = [1, 1]} : vector<4x4xf32> to vector<4x1xf32>
    %10 = vector.shape_cast %9 : vector<4x1xf32> to vector<1x4x1xf32>
    %11 = vector.broadcast %8 : vector<2x1x256xf32> to vector<2x4x256xf32>
    %12 = vector.broadcast %10 : vector<1x4x1xf32> to vector<2x4x256xf32>
    %13 = arith.mulf %11, %12 : vector<2x4x256xf32>
    %14 = arith.addf %7, %13 : vector<2x4x256xf32>
    %15 = vector.extract_strided_slice %0 {offsets = [0, 2, 0], sizes = [2, 1, 256], strides = [1, 1, 1]} : vector<2x4x256xf32> to vector<2x1x256xf32>
    %16 = vector.extract_strided_slice %1 {offsets = [0, 2], sizes = [4, 1], strides = [1, 1]} : vector<4x4xf32> to vector<4x1xf32>
    %17 = vector.shape_cast %16 : vector<4x1xf32> to vector<1x4x1xf32>
    %18 = vector.broadcast %15 : vector<2x1x256xf32> to vector<2x4x256xf32>
    %19 = vector.broadcast %17 : vector<1x4x1xf32> to vector<2x4x256xf32>
    %20 = arith.mulf %18, %19 : vector<2x4x256xf32>
    %21 = arith.addf %14, %20 : vector<2x4x256xf32>
    %22 = vector.extract_strided_slice %0 {offsets = [0, 3, 0], sizes = [2, 1, 256], strides = [1, 1, 1]} : vector<2x4x256xf32> to vector<2x1x256xf32>
    %23 = vector.extract_strided_slice %1 {offsets = [0, 3], sizes = [4, 1], strides = [1, 1]} : vector<4x4xf32> to vector<4x1xf32>
    %24 = vector.shape_cast %23 : vector<4x1xf32> to vector<1x4x1xf32>
    %25 = vector.broadcast %22 : vector<2x1x256xf32> to vector<2x4x256xf32>
    %26 = vector.broadcast %24 : vector<1x4x1xf32> to vector<2x4x256xf32>
    %27 = arith.mulf %25, %26 : vector<2x4x256xf32>
    %28 = arith.addf %21, %27 : vector<2x4x256xf32>
    %c0_4 = arith.constant 0 : index
    %c0_5 = arith.constant 0 : index
    %29 = vector.load %arg4[%c0_4, %c0_5] : memref<4x1xf32, #tpu.memory_space<vmem>>, vector<4x1xf32>
    %30 = vector.shape_cast %29 : vector<4x1xf32> to vector<1x4x1xf32>
    %31 = vector.broadcast %30 : vector<1x4x1xf32> to vector<2x4x256xf32>
    %32 = arith.addf %28, %31 : vector<2x4x256xf32>
    %c0_6 = arith.constant 0 : index
    %c0_7 = arith.constant 0 : index
    %c0_8 = arith.constant 0 : index
    %33 = vector.load %arg5[%c0_6, %c0_7, %c0_8] : memref<2x4x256xf32, #tpu.memory_space<vmem>>, vector<2x4x256xf32>
    tpu.vector_store %arg5[%c0_6, %c0_7, %c0_8], %32 {strides = array<i32>} : memref<2x4x256xf32, #tpu.memory_space<vmem>>, vector<2x4x256xf32>,
    return
  }
  func.func @transform_0(%arg0: i32, %arg1: i32) -> (i32, i32, i32) {
    %c0_i32 = arith.constant 0 : i32
    %c0_i32_0 = arith.constant 0 : i32
    return %arg0, %c0_i32, %arg1 : i32, i32, i32
  }
  func.func @transform_1(%arg0: i32, %arg1: i32) -> (i32, i32) {
    %c0_i32 = arith.constant 0 : i32
    %c0_i32_0 = arith.constant 0 : i32
    %c0_i32_1 = arith.constant 0 : i32
    return %c0_i32, %c0_i32_0 : i32, i32
  }
  func.func @transform_2(%arg0: i32, %arg1: i32) -> (i32, i32) {
    %c0_i32 = arith.constant 0 : i32
    %c0_i32_0 = arith.constant 0 : i32
    %c0_i32_1 = arith.constant 0 : i32
    return %c0_i32, %c0_i32_0 : i32, i32
  }
  func.func @transform_3(%arg0: i32, %arg1: i32) -> (i32, i32, i32) {
    %c0_i32 = arith.constant 0 : i32
    %c0_i32_0 = arith.constant 0 : i32
    return %arg0, %c0_i32, %arg1 : i32, i32, i32
  }
}

</mosaic_0001>

<bundles_post_ra>
// kernel: tpu_custom_call.1
= control target key start
LH: loop header
LB: loop body
LE: loop exit
PB: predicated region body
PF: predicated region fallthrough
CT: control target
= control target key end

     0   :  { %8 = vsyncpa [#allocation3], 0  ;;  %s364_s0 = inlined_call_operand.hbm [shape: f32[2,4,256], index: 0, kind: input, shape index: {}]   ;;  %s365_s1 = inlined_call_operand.vmem [shape: f32[4,4], index: 1, kind: input, shape index: {}]   ;;  %s366_s2 = inlined_call_operand.vmem [shape: f32[4,1], index: 2, kind: input, shape index: {}]   ;;  %s367_s3 = inlined_call_operand.hbm [shape: f32[2,4,256], index: 3, kind: output, shape index: {}]  }
   0x1   :  { %9 = vsyncpa [#allocation4], 0  ;;  %s318_s12 = smov [#allocation2]  }
   0x2   :  { %s15_s13 = sshll.u32 %s318_s12, 4  ;;  %s16_s13 = int_to_ptr.vmem [resolvable:$true] %s15_s13 }
   0x3   :  { %s282_s14 = scalar_lea.vmem %s16_s13, 256  ;;  %p287_p1 = scmp.lt.s32.totalorder %s16_s13, %s16_s13 }
   0x4   :  { %p283_p0 = scmp.ne.s32.totalorder %s16_s13, %s282_s14  ;;  %p288_p2 = scmp.lt.s32.totalorder %s282_s14, %s282_s14 }
   0x6   :  { %p289_p3 = por %p288_p2, %p287_p1 }
   0x8   :  { %p290_p4 = pnand %p289_p3, %p283_p0 }
   0xa   :  { %293 = shalt.err (!%p290_p4)
}
   0xb   :  { %s319_s15 = smov 128   ;;  %s320_s16 = smov 8  }
   0xc   :  { %21 = dma.hbm_to_vmem [thread:$0]  %s364_s0, 256, %s16_s13, [#allocation3], %s319_s15, %s319_s15, %s320_s16  }
   0xd   :  { %314 = dma.done.wait [#allocation3], 256  }
   0xe   :  { %315 = vsyncadd [#allocation3], 4294967040  ;;  %v321_v0 = vmov 0   ;;  %v322_v1 = vmov 2   ;;  %v31_v2 = vld [vmem:[%s365_s1] sm:$0xf]  ;;  %v34_v6 = vlaneseq }
   0xf   :  { %268 = vset.pattern.permute.xlu0 %v321_v0  ;;  %270 = vset.pattern.permute.xlu1 %v322_v1  ;;  %v323_v3 = vmov 1   ;;  %v324_v4 = vmov 3   ;;  %v223_v5 = vld [vmem:[%s366_s2] sm:$0xf]  ;;  %v30_v11 = vld [vmem:[#allocation2 + $0x8] sm:$0xff]  ;;  %s325_s1 = smov [#allocation5]  }
  0x10   :  { %72 = vperm.xlu0 %268, %v31_v2   ;;  %164 = vperm.xlu1 %270, %v31_v2   ;;  %v35_v7 = vshrl.u32 %v34_v6, 7  ;;  %v29_v10 = vld [vmem:[#allocation2] sm:$0xff]  ;;  %s248_s2 = sshll.u32 %s325_s1, 4  ;;  %s249_s2 = int_to_ptr.vmem [resolvable:$true] %s248_s2 }
  0x11   :  { %s294_s22 = scalar_lea.vmem %s249_s2, 256  ;;  %p299_p6 = scmp.lt.s32.totalorder %s249_s2, %s249_s2 }
  0x12   :  { %v36_v8 = vsub.s32 0, %v35_v7  ;;  %v40_v9 = vsub.s32 4, %v35_v7  ;;  %v129_v12 = vsub.s32 2, %v35_v7  ;;  %v133_v13 = vsub.s32 6, %v35_v7  ;;  %p295_p5 = scmp.ne.s32.totalorder %s249_s2, %s294_s22  ;;  %p300_p7 = scmp.lt.s32.totalorder %s294_s22, %s294_s22 }
  0x13   :  { %v81_v14 = vsub.s32 1, %v35_v7  ;;  %v85_v15 = vsub.s32 5, %v35_v7  ;;  %v177_v16 = vsub.s32 3, %v35_v7  ;;  %v181_v17 = vsub.s32 7, %v35_v7 }
  0x14   :  { %269 = vset.pattern.permute.xlu0 %v323_v3  ;;  %271 = vset.pattern.permute.xlu1 %v324_v4  ;;  %v37_v18 = vrot.slane %v29_v10, %v36_v8  ;;  %v41_v19 = vrot.slane %v29_v10, %v40_v9  ;;  %v45_v20 = vrot.slane %v30_v11, %v36_v8  ;;  %p301_p8 = por %p300_p7, %p299_p6 }
  0x15   :  { %116 = vperm.xlu0 %269, %v31_v2   ;;  %212 = vperm.xlu1 %271, %v31_v2   ;;  %v49_v21 = vrot.slane %v30_v11, %v40_v9  ;;  %v130_v22 = vrot.slane %v29_v10, %v129_v12  ;;  %v134_v23 = vrot.slane %v29_v10, %v133_v13 }
  0x16   :  { %v138_v24 = vrot.slane %v30_v11, %v129_v12  ;;  %v142_v25 = vrot.slane %v30_v11, %v133_v13  ;;  %v82_v26 = vrot.slane %v29_v10, %v81_v14  ;;  %v86_v27 = vrot.slane %v29_v10, %v85_v15  ;;  %p302_p9 = pnand %p301_p8, %p295_p5 }
  0x17   :  { %v90_v28 = vrot.slane %v30_v11, %v81_v14  ;;  %v94_v29 = vrot.slane %v30_v11, %v85_v15  ;;  %v178_v30 = vrot.slane %v29_v10, %v177_v16  ;;  %v182_v31 = vrot.slane %v29_v10, %v181_v17 }
  0x18   :  { %v186_v32 = vrot.slane %v30_v11, %v177_v16  ;;  %v190_v33 = vrot.slane %v30_v11, %v181_v17  ;;  %v57_v35 = vrot.slane %v37_v18, %v36_v8  ;;  %v61_v36 = vrot.slane %v41_v19, %v36_v8 }
  0x19   :  { %272 = vset.pattern.permute.xlu1 %v321_v0  ;;  %273 = vset.pattern.permute.xlu0 %v321_v0  ;;  %v65_v37 = vrot.slane %v45_v20, %v36_v8  ;;  %v69_v38 = vrot.slane %v49_v21, %v36_v8  ;;  %v150_v40 = vrot.slane %v130_v22, %v129_v12 }
  0x1a   :  { %226 = vperm.xlu1 %272, %v223_v5   ;;  %v154_v41 = vrot.slane %v134_v23, %v129_v12  ;;  %v158_v42 = vrot.slane %v138_v24, %v129_v12  ;;  %v162_v43 = vrot.slane %v142_v25, %v129_v12  ;;  %v102_v44 = vrot.slane %v82_v26, %v81_v14 }
  0x1b   :  { %v106_v45 = vrot.slane %v86_v27, %v81_v14  ;;  %v110_v46 = vrot.slane %v90_v28, %v81_v14  ;;  %v114_v47 = vrot.slane %v94_v29, %v81_v14  ;;  %v198_v48 = vrot.slane %v178_v30, %v177_v16 }
  0x1c   :  { %v202_v49 = vrot.slane %v182_v31, %v177_v16  ;;  %v206_v50 = vrot.slane %v186_v32, %v177_v16  ;;  %v210_v51 = vrot.slane %v190_v33, %v177_v16 }
  0x8b   :  { %v73_v34 = vpop.permute.xlu0 %72  ;;  %v165_v39 = vpop.permute.xlu1 %164 }
  0x8c   :  { %v75_v52 = vmul.f32 %v73_v34, %v57_v35  ;;  %v76_v53 = vmul.f32 %v73_v34, %v61_v36  ;;  %v77_v54 = vmul.f32 %v73_v34, %v65_v37  ;;  %v78_v55 = vmul.f32 %v73_v34, %v69_v38 }
  0x8d   :  { %v167_v56 = vmul.f32 %v165_v39, %v150_v40  ;;  %v168_v57 = vmul.f32 %v165_v39, %v154_v41  ;;  %v169_v58 = vmul.f32 %v165_v39, %v158_v42  ;;  %v170_v59 = vmul.f32 %v165_v39, %v162_v43 }
  0x90   :  { %v117_v60 = vpop.permute.xlu0 %116  ;;  %v213_v61 = vpop.permute.xlu1 %212 }
  0x91   :  { %v119_v62 = vmul.f32 %v117_v60, %v102_v44  ;;  %v120_v63 = vmul.f32 %v117_v60, %v106_v45  ;;  %v121_v0 = vmul.f32 %v117_v60, %v110_v46  ;;  %v122_v1 = vmul.f32 %v117_v60, %v114_v47 }
  0x92   :  { %v215_v2 = vmul.f32 %v213_v61, %v198_v48  ;;  %v216_v3 = vmul.f32 %v213_v61, %v202_v49  ;;  %v217_v4 = vmul.f32 %v213_v61, %v206_v50  ;;  %v218_v5 = vmul.f32 %v213_v61, %v210_v51 }
  0x93   :  { %v123_v6 = vadd.f32 %v119_v62, %v75_v52  ;;  %v124_v7 = vadd.f32 %v120_v63, %v76_v53  ;;  %v125_v8 = vadd.f32 %v121_v0, %v77_v54  ;;  %v126_v9 = vadd.f32 %v122_v1, %v78_v55 }
  0x95   :  { %v171_v10 = vadd.f32 %v167_v56, %v123_v6  ;;  %v172_v11 = vadd.f32 %v168_v57, %v124_v7  ;;  %v173_v12 = vadd.f32 %v169_v58, %v125_v8  ;;  %v174_v13 = vadd.f32 %v170_v59, %v126_v9  ;;  %v227_v14 = vpop.permute.xlu1 %226 }
  0x97   :  { %v219_v15 = vadd.f32 %v215_v2, %v171_v10  ;;  %v220_v16 = vadd.f32 %v216_v3, %v172_v11  ;;  %v221_v17 = vadd.f32 %v217_v4, %v173_v12  ;;  %v222_v18 = vadd.f32 %v218_v5, %v174_v13 }
  0x99   :  { %v229_v19 = vadd.f32 %v227_v14, %v219_v15  ;;  %v230_v20 = vadd.f32 %v227_v14, %v220_v16  ;;  %v231_v21 = vadd.f32 %v227_v14, %v221_v17  ;;  %v232_v22 = vadd.f32 %v227_v14, %v222_v18 }
  0x9b   :  { %v237_v23 = vcombine.low %v229_v19, %v230_v20  ;;  %v238_v24 = vcombine.low %v231_v21, %v232_v22 }
  0x9d   :  { %241 = vst [vmem:[#allocation5] sm:$0xff] %v237_v23  ;;  %242 = vst [vmem:[#allocation5 + $0x8] sm:$0xff] %v238_v24 }
  0x9e   :  { %305 = shalt.err (!%p302_p9)
}
  0x9f   :  { %254 = dma.vmem_to_hbm [thread:$0]  %s249_s2, 256, %s367_s3, [#allocation4], %s319_s15, %s319_s15, %s320_s16  }
  0xa0   :  { %316 = dma.done.wait [#allocation4], 256  }
  0xa1   :  { %317 = vsyncadd [#allocation4], 4294967040 }
  0xa2   :  { %258 = vsyncpa [#allocation3], 1 }
  0xa3   :  { %259 = vsyncpa [#allocation4], 1 }

</bundles_post_ra>
